<compile_context>
chip_gen: v7x
topology: tpu7x:2x2x1
jax: 0.10.0
libtpu: 0.0.40
codegen_flags: <defaults>
</compile_context>

<pallas_src>
import jax
import jax.numpy as jnp
from jax.experimental import pallas as pl
from jax.experimental.pallas import tpu as pltpu

_NEG = -1e30   # bias for padded logit columns -> exp() underflows to 0 in LSE


# ----------------------------------------------------------------------------
# small helpers
# ----------------------------------------------------------------------------
def _round_up(x, m):
    return ((x + m - 1) // m) * m


def _pad_last(a, to, value=0.0):
    pad = to - a.shape[-1]
    if pad <= 0:
        return a
    cfg = [(0, 0)] * (a.ndim - 1) + [(0, pad)]
    return jnp.pad(a, cfg, constant_values=value)


def _pad_first(a, to, value=0.0):
    pad = to - a.shape[0]
    if pad <= 0:
        return a
    cfg = [(0, pad)] + [(0, 0)] * (a.ndim - 1)
    return jnp.pad(a, cfg, constant_values=value)


# ----------------------------------------------------------------------------
# Fused tail+rel MLP heads + cross-entropy (class-tiled flash-CE Pallas kernel)
# ----------------------------------------------------------------------------
def fused_tail_rel_mlp_ce(x, r, lab_t, lab_r,
                          w1t, gb_t, w2_t, b2_t,
                          w1r, gb_r, w2_r, b2_r,
                          *, tile_rows=256, tile_classes=512, return_pred=True):
    """tail: logits_t = tanh([x||r] @ w1t + gb_t) @ w2_t + b2_t   (class-tiled)
       rel : logits_r = tanh(   x    @ w1r + gb_r) @ w2_r + b2_r  (small classes)
       loss = sum over valid rows of (logsumexp(logits) - logits[label]).

    All matmul operands are bf16 (MXU); accumulation / tanh / online-LSE are
    f32.  Hidden & class dims must be pre-padded (padded class columns carry a
    -1e30 bias so they vanish from the LSE).  Returns
    (tail_logits[:E] | None, rel_logits[:E] | None, tail_loss_sum, rel_loss_sum)."""
    E, Dx = x.shape
    Dr = r.shape[1]
    Ht_p = w1t.shape[1]
    Hr_p = w1r.shape[1]
    Ct_p = w2_t.shape[1]
    Cr_p = w2_r.shape[1]
    assert w1t.shape[0] == Dx + Dr

    TC = min(tile_classes, Ct_p)
    assert Ct_p % TC == 0, (Ct_p, TC)
    grid_classes = Ct_p // TC

    TE = min(tile_rows, _round_up(E, 16))       # bf16 sublane packing -> mult of 16
    E_pad = _round_up(E, TE)
    grid_rows = E_pad // TE
    if grid_rows == 1 and E > 32:
        # v7x megacore: split the row range so both TensorCores get a tile.
        TE = max(16, _round_up((E + 1) // 2, 16))
        E_pad = _round_up(E, TE)
        grid_rows = E_pad // TE

    x_p = _pad_first(x, E_pad)
    r_p = _pad_first(r, E_pad)
    lt_p = _pad_first(lab_t.astype(jnp.int32).reshape(E, 1), E_pad)
    lr_p = _pad_first(lab_r.astype(jnp.int32).reshape(E, 1), E_pad)

    def kernel(x_ref, r_ref, labt_ref, labr_ref,
               w1t_ref, gbt_ref, w2t_ref, b2t_ref,
               w1r_ref, gbr_ref, w2r_ref, b2r_ref,
               *rest):
        if return_pred:
            (predt_ref, predr_ref, losst_ref, lossr_ref,
             h_ref, m_ref, l_ref, tgt_ref) = rest
        else:
            losst_ref, lossr_ref, h_ref, m_ref, l_ref, tgt_ref = rest

        i = pl.program_id(0)
        j = pl.program_id(1)
        nj = pl.num_programs(1)

        row = jax.lax.broadcasted_iota(jnp.int32, (TE, 1), 0) + i * TE
        valid = row < E                                   # mask padded rows

        # ---- j == 0: first layers (one fused MXU dot for tail) + rel head ----
        @pl.when(j == 0)
        def _():
            xv = x_ref[...]                               # (TE, Dx)  bf16
            rv = r_ref[...]                               # (TE, Dr)  bf16
            xr = jnp.concatenate([xv, rv], axis=1)        # VMEM-only concat
            pre_t = (jnp.dot(xr, w1t_ref[...],
                             preferred_element_type=jnp.float32) + gbt_ref[...])
            h_ref[...] = jnp.tanh(pre_t).astype(jnp.bfloat16)
            m_ref[...] = jnp.full_like(m_ref, -jnp.inf)
            l_ref[...] = jnp.zeros_like(l_ref)
            tgt_ref[...] = jnp.zeros_like(tgt_ref)

            # rel head: class count is small -> done fully in the first step
            pre_r = (jnp.dot(xv, w1r_ref[...],
                             preferred_element_type=jnp.float32) + gbr_ref[...])
            h_r = jnp.tanh(pre_r).astype(jnp.bfloat16)
            logits_r = (jnp.dot(h_r, w2r_ref[...],
                                preferred_element_type=jnp.float32) + b2r_ref[...])
            m_r = jnp.max(logits_r, axis=-1, keepdims=True)
            lse_r = m_r + jnp.log(jnp.sum(jnp.exp(logits_r - m_r),
                                          axis=-1, keepdims=True))
            col_r = jax.lax.broadcasted_iota(jnp.int32, logits_r.shape, 1)
            tgt_r = jnp.sum(jnp.where(col_r == labr_ref[...], logits_r, 0.0),
                            axis=-1, keepdims=True)
            lossr_ref[...] = jnp.broadcast_to(
                jnp.sum(jnp.where(valid, lse_r - tgt_r, 0.0)), (1, 8, 128))
            if return_pred:
                predr_ref[...] = logits_r.astype(predr_ref.dtype)

        # ---- every j: one class tile of the tail classifier (online LSE) ----
        logits = (jnp.dot(h_ref[...], w2t_ref[...],
                          preferred_element_type=jnp.float32) + b2t_ref[...])
        if return_pred:
            predt_ref[...] = logits.astype(predt_ref.dtype)

        m_prev = m_ref[...]
        m_new = jnp.maximum(m_prev, jnp.max(logits, axis=-1, keepdims=True))
        l_ref[...] = (l_ref[...] * jnp.exp(m_prev - m_new)
                      + jnp.sum(jnp.exp(logits - m_new), axis=-1, keepdims=True))
        m_ref[...] = m_new
        col = jax.lax.broadcasted_iota(jnp.int32, logits.shape, 1) + j * TC
        tgt_ref[...] = tgt_ref[...] + jnp.sum(
            jnp.where(col == labt_ref[...], logits, 0.0), axis=-1, keepdims=True)

        # ---- j == last: finalize tail loss for this row tile -----------------
        @pl.when(j == nj - 1)
        def _():
            lse_t = m_ref[...] + jnp.log(l_ref[...])
            losst_ref[...] = jnp.broadcast_to(
                jnp.sum(jnp.where(valid, lse_t - tgt_ref[...], 0.0)), (1, 8, 128))

    row_blk = lambda i, j: (i, 0)
    cst_blk = lambda i, j: (0, 0)
    keep = pl.Buffered(1)          # constant block index -> single VMEM buffer

    in_specs = [
        pl.BlockSpec((TE, Dx), row_blk),                 # x rows (per row tile)
        pl.BlockSpec((TE, Dr), row_blk),                 # rel-emb rows
        pl.BlockSpec((TE, 1), row_blk),                  # tail labels
        pl.BlockSpec((TE, 1), row_blk),                  # rel labels
        pl.BlockSpec((Dx + Dr, Ht_p), cst_blk, pipeline_mode=keep),   # stacked w1 tail
        pl.BlockSpec((1, Ht_p), cst_blk, pipeline_mode=keep),         # folded graph+bias
        pl.BlockSpec((Ht_p, TC), lambda i, j: (0, j)),   # w2_t: streamed class tiles
        pl.BlockSpec((1, TC), lambda i, j: (0, j)),      # b2_t: streamed class tiles
        pl.BlockSpec((Dx, Hr_p), cst_blk, pipeline_mode=keep),        # w1 rel
        pl.BlockSpec((1, Hr_p), cst_blk, pipeline_mode=keep),
        pl.BlockSpec((Hr_p, Cr_p), cst_blk, pipeline_mode=keep),      # w2 rel (small)
        pl.BlockSpec((1, Cr_p), cst_blk, pipeline_mode=keep),
    ]

    loss_spec = pl.BlockSpec((1, 8, 128), lambda i, j: (i, 0, 0))
    loss_shape = jax.ShapeDtypeStruct((grid_rows, 8, 128), jnp.float32)
    if return_pred:
        out_specs = [pl.BlockSpec((TE, TC), lambda i, j: (i, j)),
                     pl.BlockSpec((TE, Cr_p), row_blk),
                     loss_spec, loss_spec]
        out_shape = [jax.ShapeDtypeStruct((E_pad, Ct_p), jnp.bfloat16),
                     jax.ShapeDtypeStruct((E_pad, Cr_p), jnp.bfloat16),
                     loss_shape, loss_shape]
    else:
        out_specs = [loss_spec, loss_spec]
        out_shape = [loss_shape, loss_shape]

    scratch_shapes = [
        pltpu.VMEM((TE, Ht_p), jnp.bfloat16),    # tanh hidden, reused per class tile
        pltpu.VMEM((TE, 1), jnp.float32),        # running max
        pltpu.VMEM((TE, 1), jnp.float32),        # running sum
        pltpu.VMEM((TE, 1), jnp.float32),        # target logit
    ]

    # --- explicit scoped-VMEM budget (weights + double-buffered tiles) ------
    bf2, f4 = 2, 4
    weights_resident = (((Dx + Dr) * Ht_p + Dx * Hr_p + Hr_p * Cr_p) * bf2
                        + (Ht_p + Hr_p + Cr_p) * 8 * f4)        # sublane-padded rows
    streamed_w2 = 2 * (Ht_p * TC * bf2 + 8 * TC * f4)
    acts = 2 * TE * (Dx + Dr) * bf2 + 2 * 2 * TE * 128 * f4     # x, r, labels
    outs = 2 * 2 * 8 * 128 * f4
    if return_pred:
        outs += 2 * TE * (TC + Cr_p) * bf2
    scratch = TE * Ht_p * bf2 + 3 * TE * 128 * f4
    vmem_limit = min(int(1.3 * (weights_resident + streamed_w2 + acts + outs
                                + scratch)) + (4 << 20),
                     127 * 1024 * 1024)

    flops = 2 * E_pad * ((Dx + Dr) * Ht_p + Ht_p * Ct_p + Dx * Hr_p + Hr_p * Cr_p)
    transc = E_pad * (Ht_p + Hr_p + Ct_p + Cr_p)
    bytes_acc = (E_pad * (Dx + Dr) * bf2 + 2 * E_pad * f4
                 + weights_resident + Ht_p * Ct_p * bf2 + Ct_p * f4
                 + (E_pad * (Ct_p + Cr_p) * bf2 if return_pred else 0)
                 + 2 * grid_rows * 8 * 128 * f4)

    results = pl.pallas_call(
        kernel,
        grid=(grid_rows, grid_classes),
        in_specs=in_specs,
        out_specs=out_specs,
        out_shape=out_shape,
        scratch_shapes=scratch_shapes,
        compiler_params=pltpu.CompilerParams(
            dimension_semantics=("parallel", "arbitrary"),
            vmem_limit_bytes=vmem_limit),
        cost_estimate=pl.CostEstimate(
            flops=flops, transcendentals=transc, bytes_accessed=bytes_acc),
    )(x_p, r_p, lt_p, lr_p,
      w1t, gb_t, w2_t, b2_t,
      w1r, gb_r, w2_r, b2_r)

    if return_pred:
        pred_t, pred_r, ls_t, ls_r = results
        return pred_t[:E], pred_r[:E], ls_t[:, 0, 0].sum(), ls_r[:, 0, 0].sum()
    ls_t, ls_r = results
    return None, None, ls_t[:, 0, 0].sum(), ls_r[:, 0, 0].sum()


# ----------------------------------------------------------------------------
# EdgeModel forward (readout_node_type='static', readout_op='max',
# combiner mode 'concat', graph_conv=None, dropout=0)
# ----------------------------------------------------------------------------
def edge_model_forward(params, combined_emb, static_emb, dynamic_emb,
                       dynamic_relation_emb, edge_head, edge_tail, edge_rel,
                       node_ids, *, return_pred=True, broadcast_head_pred=False,
                       tile_rows=256, tile_classes=512):
    E = edge_head.shape[0]
    num_entities = params["head"][2].shape[1]

    # --- embedding gathers / graph readout (plain JAX glue) -----------------
    edge_head_emb = combined_emb[edge_head]                       # (E, Dc)
    dynamic_rel_emb = dynamic_relation_emb[:, :, 1]               # (R, Drel)
    # dgl.readout_nodes(op='max'): tiny [N, D] reduction -> let XLA fuse it.
    graph_emb = jnp.max(static_emb, axis=0, keepdims=True)        # (1, Dg)

    Dc = edge_head_emb.shape[1]
    Dg = graph_emb.shape[1]
    Dr = 2 * params["rel_embeds"].shape[1]

    # --- head MLP: logits identical for every edge -> compute one row once --
    hw1, hb1, hw2, hb2 = params["head"]
    head_logits = jnp.tanh(graph_emb @ hw1 + hb1) @ hw2 + hb2     # (1, n_ent)
    mh = jnp.max(head_logits)
    lse_h = mh + jnp.log(jnp.sum(jnp.exp(head_logits - mh)))
    head_labels = node_ids[edge_head]
    log_prob_head = -jnp.mean(lse_h - head_logits[0, head_labels])

    # --- tail / rel heads: fused, class-tiled Pallas kernel -----------------
    tw1, tb1, tw2, tb2 = params["tail"]
    rw1, rb1, rw2, rb2 = params["rel"]
    Ht, Ct = tw2.shape
    Hr, Cr = rw2.shape

    Dc_p = _round_up(Dc, 128)
    Dr_p = _round_up(Dr, 128)
    Ht_p = _round_up(Ht, 256)          # full MXU contraction depth on v6e/v7x
    Hr_p = _round_up(Hr, 256)
    Cr_p = _round_up(Cr, 128)
    TC = min(tile_classes, _round_up(Ct, 256))
    Ct_p = _round_up(Ct, TC)

    # Stack the per-segment first-layer weights (no [E, Din] concat in HBM);
    # fold the graph-embedding contribution + b1 into one precomputed f32 row.
    w1t_x = _pad_first(_pad_last(tw1[:Dc], Ht_p), Dc_p)
    w1t_r = _pad_first(_pad_last(tw1[Dc + Dg:], Ht_p), Dr_p)
    w1t = jnp.concatenate([w1t_x, w1t_r], axis=0).astype(jnp.bfloat16)
    gb_t = _pad_last(graph_emb @ tw1[Dc:Dc + Dg] + tb1.reshape(1, -1), Ht_p)
    w2_t = _pad_last(_pad_first(tw2, Ht_p), Ct_p).astype(jnp.bfloat16)
    b2_t = _pad_last(tb2.reshape(1, -1), Ct_p, _NEG)

    w1r = _pad_first(_pad_last(rw1[:Dc], Hr_p), Dc_p).astype(jnp.bfloat16)
    gb_r = _pad_last(graph_emb @ rw1[Dc:Dc + Dg] + rb1.reshape(1, -1), Hr_p)
    w2_r = _pad_last(_pad_first(rw2, Hr_p), Cr_p).astype(jnp.bfloat16)
    b2_r = _pad_last(rb2.reshape(1, -1), Cr_p, _NEG)

    x_bf = _pad_last(edge_head_emb, Dc_p).astype(jnp.bfloat16)    # (E, Dc_p)
    r_bf = _pad_last(jnp.concatenate([params["rel_embeds"][edge_rel],
                                      dynamic_rel_emb[edge_rel]], axis=1),
                     Dr_p).astype(jnp.bfloat16)                   # (E, Dr_p)
    lab_t = node_ids[edge_tail]
    lab_r = edge_rel

    tail_pred_p, rel_pred_p, loss_t_sum, loss_r_sum = fused_tail_rel_mlp_ce(
        x_bf, r_bf, lab_t, lab_r,
        w1t, gb_t, w2_t, b2_t,
        w1r, gb_r, w2_r, b2_r,
        tile_rows=tile_rows, tile_classes=TC, return_pred=return_pred)

    log_prob_tail = -loss_t_sum / E
    log_prob_rel = -loss_r_sum / E
    log_prob = log_prob_tail + 0.2 * log_prob_rel + 0.1 * log_prob_head

    if not return_pred:
        return log_prob

    # head logits are identical per edge; only broadcast (E x n_ent HBM write)
    # if the caller explicitly asks for it.
    head_pred = (jnp.broadcast_to(head_logits, (E, num_entities))
                 if broadcast_head_pred else head_logits)
    tail_pred = tail_pred_p[:, :Ct]     # bf16 logits (padded -1e30 cols sliced off)
    rel_pred = rel_pred_p[:, :Cr]
    return log_prob, head_pred, rel_pred, tail_pred


# ----------------------------------------------------------------------------
# Deterministic parameter construction (weights stored [in, out])
# ----------------------------------------------------------------------------
def make_params(key, num_entities, num_rels, rel_embed_dim,
                combined_dim, graph_emb_dim):
    ks = iter(jax.random.split(key, 16))

    def lin(k, din, dout):
        kw, kb = jax.random.split(k)
        w = jax.random.normal(kw, (din, dout), jnp.float32) * 0.1
        b = jax.random.normal(kb, (dout,), jnp.float32) * 0.1
        return w, b

    # transform_head : graph_emb_dim -> 4*graph_emb_dim -> num_entities
    hw1, hb1 = lin(next(ks), graph_emb_dim, 4 * graph_emb_dim)
    hw2, hb2 = lin(next(ks), 4 * graph_emb_dim, num_entities)
    # transform_rel  : (combined+graph) -> same -> num_rels
    ngd = combined_dim + graph_emb_dim
    rw1, rb1 = lin(next(ks), ngd, ngd)
    rw2, rb2 = lin(next(ks), ngd, num_rels)
    # transform_tail : (combined+graph+2*rel) -> 2x -> num_entities
    ngrd = combined_dim + graph_emb_dim + 2 * rel_embed_dim
    tw1, tb1 = lin(next(ks), ngrd, 2 * ngrd)
    tw2, tb2 = lin(next(ks), 2 * ngrd, num_entities)

    rel_embeds = jax.random.normal(next(ks), (num_rels, rel_embed_dim),
                                   jnp.float32)
    return {
        "head": (hw1, hb1, hw2, hb2),
        "rel": (rw1, rb1, rw2, rb2),
        "tail": (tw1, tb1, tw2, tb2),
        "rel_embeds": rel_embeds,
    }


# ----------------------------------------------------------------------------
# Pure-JAX f32 reference (for a tolerance check of the bf16 kernel)
# ----------------------------------------------------------------------------
def reference_log_prob(params, combined_emb, static_emb, dynamic_relation_emb,
                       edge_head, edge_tail, edge_rel, node_ids):
    graph_emb = jnp.max(static_emb, axis=0, keepdims=True)
    x = combined_emb[edge_head]
    ge = jnp.broadcast_to(graph_emb, (x.shape[0], graph_emb.shape[1]))
    drel = dynamic_relation_emb[:, :, 1]
    rcat = jnp.concatenate([params["rel_embeds"][edge_rel], drel[edge_rel]], 1)

    def mlp(inp, w1, b1, w2, b2):
        return jnp.tanh(inp @ w1 + b1) @ w2 + b2

    def ce(logits, lab):
        m = jnp.max(logits, axis=-1, keepdims=True)
        lse = m[:, 0] + jnp.log(jnp.sum(jnp.exp(logits - m), axis=-1))
        tgt = jnp.take_along_axis(logits, lab[:, None], axis=-1)[:, 0]
        return jnp.mean(lse - tgt)

    tw1, tb1, tw2, tb2 = params["tail"]
    rw1, rb1, rw2, rb2 = params["rel"]
    hw1, hb1, hw2, hb2 = params["head"]
    ce_t = ce(mlp(jnp.concatenate([x, ge, rcat], 1), tw1, tb1, tw2, tb2),
              node_ids[edge_tail])
    ce_r = ce(mlp(jnp.concatenate([x, ge], 1), rw1, rb1, rw2, rb2), edge_rel)
    ce_h = ce(mlp(ge, hw1, hb1, hw2, hb2), node_ids[edge_head])
    return -(ce_t + 0.2 * ce_r + 0.1 * ce_h)


if __name__ == "__main__":
    # small, module-consistent shapes
    num_entities = 32
    num_rels = 8
    rel_embed_dim = 8
    static_dim = 16
    dynamic_dim = 16
    combined_dim = static_dim + dynamic_dim     # combiner mode 'concat'
    graph_emb_dim = static_dim                  # readout_node_type='static', op='max'
    N_nodes = 12
    E_edges = 16

    key = jax.random.PRNGKey(0)
    k_par, k_c, k_s, k_d, k_dr, k_eh, k_et, k_er, k_nid = jax.random.split(key, 9)

    params = make_params(k_par, num_entities, num_rels, rel_embed_dim,
                         combined_dim, graph_emb_dim)

    combined_emb = jax.random.normal(k_c, (N_nodes, combined_dim), jnp.float32)
    static_emb = jax.random.normal(k_s, (N_nodes, static_dim), jnp.float32)
    dynamic_emb = jax.random.normal(k_d, (N_nodes, dynamic_dim), jnp.float32)
    # [num_rels, rel_embed_dim, time] — forward slices [:, :, 1]
    dynamic_relation_emb = jax.random.normal(
        k_dr, (num_rels, rel_embed_dim, 2), jnp.float32)

    edge_head = jax.random.randint(k_eh, (E_edges,), 0, N_nodes, jnp.int32)
    edge_tail = jax.random.randint(k_et, (E_edges,), 0, N_nodes, jnp.int32)
    edge_rel = jax.random.randint(k_er, (E_edges,), 0, num_rels, jnp.int32)
    # G.ndata[dgl.NID]: mapping local node -> global entity id
    node_ids = jax.random.randint(k_nid, (N_nodes,), 0, num_entities, jnp.int32)

    fwd = jax.jit(edge_model_forward,
                  static_argnames=("return_pred", "broadcast_head_pred",
                                   "tile_rows", "tile_classes"))

    # full path (return_pred=True, materialized head_pred for shape parity)
    log_prob, head_pred, rel_pred, tail_pred = fwd(
        params, combined_emb, static_emb, dynamic_emb, dynamic_relation_emb,
        edge_head, edge_tail, edge_rel, node_ids, broadcast_head_pred=True)
    jax.block_until_ready((log_prob, head_pred, rel_pred, tail_pred))

    # loss-only fast path (drops pred outputs entirely)
    log_prob_only = fwd(
        params, combined_emb, static_emb, dynamic_emb, dynamic_relation_emb,
        edge_head, edge_tail, edge_rel, node_ids, return_pred=False)
    jax.block_until_ready(log_prob_only)

    assert head_pred.shape == (E_edges, num_entities)
    assert rel_pred.shape == (E_edges, num_rels)
    assert tail_pred.shape == (E_edges, num_entities)
    assert log_prob.shape == ()
    assert jnp.allclose(log_prob_only, log_prob, rtol=1e-3, atol=1e-3)

    # tolerance check vs pure-JAX f32 reference (bf16 MXU -> ~1e-2 level)
    ref_lp = reference_log_prob(params, combined_emb, static_emb,
                                dynamic_relation_emb, edge_head, edge_tail,
                                edge_rel, node_ids)
    assert jnp.allclose(log_prob, ref_lp, rtol=5e-2, atol=5e-2), (log_prob, ref_lp)

    print("KERNEL_OK")
</pallas_src>

<mosaic_0001>
module attributes {stable_mosaic.version = 11 : i64} {
  func.func @kernel(%arg0: i32, %arg1: i32, %arg2: memref<16x128xbf16, #tpu.memory_space<vmem>>, %arg3: memref<16x128xbf16, #tpu.memory_space<vmem>>, %arg4: memref<16x1xi32, #tpu.memory_space<vmem>>, %arg5: memref<16x1xi32, #tpu.memory_space<vmem>>, %arg6: memref<256x256xbf16, #tpu.memory_space<vmem>>, %arg7: memref<1x256xf32, #tpu.memory_space<vmem>>, %arg8: memref<256x256xbf16, #tpu.memory_space<vmem>>, %arg9: memref<1x256xf32, #tpu.memory_space<vmem>>, %arg10: memref<128x256xbf16, #tpu.memory_space<vmem>>, %arg11: memref<1x256xf32, #tpu.memory_space<vmem>>, %arg12: memref<256x128xbf16, #tpu.memory_space<vmem>>, %arg13: memref<1x128xf32, #tpu.memory_space<vmem>>, %arg14: memref<16x256xbf16, #tpu.memory_space<vmem>>, %arg15: memref<16x128xbf16, #tpu.memory_space<vmem>>, %arg16: memref<1x8x128xf32, #tpu.memory_space<vmem>>, %arg17: memref<1x8x128xf32, #tpu.memory_space<vmem>>, %arg18: memref<16x256xbf16, #tpu.memory_space<vmem>>, %arg19: memref<16x1xf32, #tpu.memory_space<vmem>>, %arg20: memref<16x1xf32, #tpu.memory_space<vmem>>, %arg21: memref<16x1xf32, #tpu.memory_space<vmem>>) attributes {dimension_semantics = [#tpu.dimension_semantics<parallel>, #tpu.dimension_semantics<arbitrary>], iteration_bounds = array<i64: 1, 1>, scalar_prefetch = 0 : i64, scratch_operands = 4 : i64, tpu.core_type = #tpu.core_type<tc>, window_params = [{transform_indices = @transform_0, window_bounds = array<i64: 16, 128>}, {transform_indices = @transform_1, window_bounds = array<i64: 16, 128>}, {transform_indices = @transform_2, window_bounds = array<i64: 16, 1>}, {transform_indices = @transform_3, window_bounds = array<i64: 16, 1>}, {pipeline_mode = #tpu.pipeline_mode<synchronous>, transform_indices = @transform_4, window_bounds = array<i64: 256, 256>}, {pipeline_mode = #tpu.pipeline_mode<synchronous>, transform_indices = @transform_5, window_bounds = array<i64: 1, 256>}, {transform_indices = @transform_6, window_bounds = array<i64: 256, 256>}, {transform_indices = @transform_7, window_bounds = array<i64: 1, 256>}, {pipeline_mode = #tpu.pipeline_mode<synchronous>, transform_indices = @transform_8, window_bounds = array<i64: 128, 256>}, {pipeline_mode = #tpu.pipeline_mode<synchronous>, transform_indices = @transform_9, window_bounds = array<i64: 1, 256>}, {pipeline_mode = #tpu.pipeline_mode<synchronous>, transform_indices = @transform_10, window_bounds = array<i64: 256, 128>}, {pipeline_mode = #tpu.pipeline_mode<synchronous>, transform_indices = @transform_11, window_bounds = array<i64: 1, 128>}, {transform_indices = @transform_12, window_bounds = array<i64: 16, 256>}, {transform_indices = @transform_13, window_bounds = array<i64: 16, 128>}, {transform_indices = @transform_14, window_bounds = array<i64: 1, 8, 128>}, {transform_indices = @transform_15, window_bounds = array<i64: 1, 8, 128>}]} {
    %0 = tpu.iota {dimensions = array<i32: 0>} : vector<16x1xi32>
    %c16_i32 = arith.constant 16 : i32
    %1 = arith.muli %arg0, %c16_i32 : i32
    %2 = vector.broadcast %1 : i32 to vector<16x1xi32>
    %3 = arith.addi %0, %2 : vector<16x1xi32>
    %c16_i32_0 = arith.constant 16 : i32
    %4 = vector.broadcast %c16_i32_0 : i32 to vector<16x1xi32>
    %5 = arith.cmpi slt, %3, %4 : vector<16x1xi32>
    %c0_i32 = arith.constant 0 : i32
    %6 = arith.cmpi eq, %arg1, %c0_i32 : i32
    %7 = arith.extui %6 : i1 to i32
    %c0_i32_1 = arith.constant 0 : i32
    %8 = arith.cmpi ne, %7, %c0_i32_1 : i32
    scf.if %8 {
      %c0_29 = arith.constant 0 : index
      %c0_30 = arith.constant 0 : index
      %50 = vector.load %arg2[%c0_29, %c0_30] : memref<16x128xbf16, #tpu.memory_space<vmem>>, vector<16x128xbf16>
      %c0_31 = arith.constant 0 : index
      %c0_32 = arith.constant 0 : index
      %51 = vector.load %arg3[%c0_31, %c0_32] : memref<16x128xbf16, #tpu.memory_space<vmem>>, vector<16x128xbf16>
      %52 = tpu.concatenate %50, %51 in 1 : vector<16x128xbf16>, vector<16x128xbf16> -> vector<16x256xbf16>
      %c0_33 = arith.constant 0 : index
      %c0_34 = arith.constant 0 : index
      %53 = vector.load %arg6[%c0_33, %c0_34] : memref<256x256xbf16, #tpu.memory_space<vmem>>, vector<256x256xbf16>
      %cst_35 = arith.constant dense<0.000000e+00> : vector<16x256xf32>
      %54 = tpu.matmul %52, %53, %cst_35 {dimension_numbers = #tpu.dot_dimension_numbers<[1], [0], [0], [1], [0, 0, 1, 1], [], []>} : vector<16x256xbf16>, vector<256x256xbf16>, vector<16x256xf32> -> vector<16x256xf32>
      %c0_36 = arith.constant 0 : index
      %c0_37 = arith.constant 0 : index
      %55 = vector.load %arg7[%c0_36, %c0_37] : memref<1x256xf32, #tpu.memory_space<vmem>>, vector<1x256xf32>
      %56 = vector.broadcast %55 : vector<1x256xf32> to vector<16x256xf32>
      %57 = arith.addf %54, %56 : vector<16x256xf32>
      %58 = math.tanh %57 : vector<16x256xf32>
      %59 = arith.truncf %58 : vector<16x256xf32> to vector<16x256xbf16>
      %c0_38 = arith.constant 0 : index
      %c0_39 = arith.constant 0 : index
      %60 = vector.load %arg18[%c0_38, %c0_39] : memref<16x256xbf16, #tpu.memory_space<vmem>>, vector<16x256xbf16>
      tpu.vector_store %arg18[%c0_38, %c0_39], %59 {strides = array<i32>} : memref<16x256xbf16, #tpu.memory_space<vmem>>, vector<16x256xbf16>,
      %cst_40 = arith.constant 0xFF800000 : f32
      %61 = vector.broadcast %cst_40 : f32 to vector<16x1xf32>
      %c0_41 = arith.constant 0 : index
      %c0_42 = arith.constant 0 : index
      %62 = vector.load %arg19[%c0_41, %c0_42] : memref<16x1xf32, #tpu.memory_space<vmem>>, vector<16x1xf32>
      tpu.vector_store %arg19[%c0_41, %c0_42], %61 {strides = array<i32>} : memref<16x1xf32, #tpu.memory_space<vmem>>, vector<16x1xf32>,
      %cst_43 = arith.constant 0.000000e+00 : f32
      %63 = vector.broadcast %cst_43 : f32 to vector<16x1xf32>
      %c0_44 = arith.constant 0 : index
      %c0_45 = arith.constant 0 : index
      %64 = vector.load %arg20[%c0_44, %c0_45] : memref<16x1xf32, #tpu.memory_space<vmem>>, vector<16x1xf32>
      tpu.vector_store %arg20[%c0_44, %c0_45], %63 {strides = array<i32>} : memref<16x1xf32, #tpu.memory_space<vmem>>, vector<16x1xf32>,
      %cst_46 = arith.constant 0.000000e+00 : f32
      %65 = vector.broadcast %cst_46 : f32 to vector<16x1xf32>
      %c0_47 = arith.constant 0 : index
      %c0_48 = arith.constant 0 : index
      %66 = vector.load %arg21[%c0_47, %c0_48] : memref<16x1xf32, #tpu.memory_space<vmem>>, vector<16x1xf32>
      tpu.vector_store %arg21[%c0_47, %c0_48], %65 {strides = array<i32>} : memref<16x1xf32, #tpu.memory_space<vmem>>, vector<16x1xf32>,
      %c0_49 = arith.constant 0 : index
      %c0_50 = arith.constant 0 : index
      %67 = vector.load %arg10[%c0_49, %c0_50] : memref<128x256xbf16, #tpu.memory_space<vmem>>, vector<128x256xbf16>
      %cst_51 = arith.constant dense<0.000000e+00> : vector<16x256xf32>
      %68 = tpu.matmul %50, %67, %cst_51 {dimension_numbers = #tpu.dot_dimension_numbers<[1], [0], [0], [1], [0, 0, 1, 1], [], []>} : vector<16x128xbf16>, vector<128x256xbf16>, vector<16x256xf32> -> vector<16x256xf32>
      %c0_52 = arith.constant 0 : index
      %c0_53 = arith.constant 0 : index
      %69 = vector.load %arg11[%c0_52, %c0_53] : memref<1x256xf32, #tpu.memory_space<vmem>>, vector<1x256xf32>
      %70 = vector.broadcast %69 : vector<1x256xf32> to vector<16x256xf32>
      %71 = arith.addf %68, %70 : vector<16x256xf32>
      %72 = math.tanh %71 : vector<16x256xf32>
      %73 = arith.truncf %72 : vector<16x256xf32> to vector<16x256xbf16>
      %c0_54 = arith.constant 0 : index
      %c0_55 = arith.constant 0 : index
      %74 = vector.load %arg12[%c0_54, %c0_55] : memref<256x128xbf16, #tpu.memory_space<vmem>>, vector<256x128xbf16>
      %cst_56 = arith.constant dense<0.000000e+00> : vector<16x128xf32>
      %75 = tpu.matmul %73, %74, %cst_56 {dimension_numbers = #tpu.dot_dimension_numbers<[1], [0], [0], [1], [0, 0, 1, 1], [], []>} : vector<16x256xbf16>, vector<256x128xbf16>, vector<16x128xf32> -> vector<16x128xf32>
      %c0_57 = arith.constant 0 : index
      %c0_58 = arith.constant 0 : index
      %76 = vector.load %arg13[%c0_57, %c0_58] : memref<1x128xf32, #tpu.memory_space<vmem>>, vector<1x128xf32>
      %77 = vector.broadcast %76 : vector<1x128xf32> to vector<16x128xf32>
      %78 = arith.addf %75, %77 : vector<16x128xf32>
      %cst_59 = arith.constant dense<0xFF800000> : vector<16xf32>
      %79 = vector.multi_reduction <maximumf>, %78, %cst_59 [1] : vector<16x128xf32> to vector<16xf32>
      %80 = vector.shape_cast %79 : vector<16xf32> to vector<16x1xf32>
      %81 = vector.broadcast %80 : vector<16x1xf32> to vector<16x128xf32>
      %82 = arith.subf %78, %81 : vector<16x128xf32>
      %83 = math.exp %82 : vector<16x128xf32>
      %cst_60 = arith.constant dense<0.000000e+00> : vector<16xf32>
      %84 = vector.multi_reduction <add>, %83, %cst_60 [1] : vector<16x128xf32> to vector<16xf32>
      %85 = vector.shape_cast %84 : vector<16xf32> to vector<16x1xf32>
      %86 = math.log %85 : vector<16x1xf32>
      %87 = arith.addf %80, %86 : vector<16x1xf32>
      %88 = tpu.iota {dimensions = array<i32: 1>} : vector<16x128xi32>
      %c0_61 = arith.constant 0 : index
      %c0_62 = arith.constant 0 : index
      %89 = vector.load %arg5[%c0_61, %c0_62] : memref<16x1xi32, #tpu.memory_space<vmem>>, vector<16x1xi32>
      %90 = vector.broadcast %89 : vector<16x1xi32> to vector<16x128xi32>
      %91 = arith.cmpi eq, %88, %90 : vector<16x128xi32>
      %cst_63 = arith.constant 0.000000e+00 : f32
      %92 = vector.broadcast %cst_63 : f32 to vector<16x128xf32>
      %93 = arith.select %91, %78, %92 : vector<16x128xi1>, vector<16x128xf32>
      %cst_64 = arith.constant dense<0.000000e+00> : vector<16xf32>
      %94 = vector.multi_reduction <add>, %93, %cst_64 [1] : vector<16x128xf32> to vector<16xf32>
      %95 = vector.shape_cast %94 : vector<16xf32> to vector<16x1xf32>
      %96 = arith.subf %87, %95 : vector<16x1xf32>
      %cst_65 = arith.constant 0.000000e+00 : f32
      %97 = vector.broadcast %cst_65 : f32 to vector<16x1xf32>
      %98 = arith.select %5, %96, %97 : vector<16x1xi1>, vector<16x1xf32>
      %99 = vector.shape_cast %98 : vector<16x1xf32> to vector<1x16x1xf32>
      %cst_66 = arith.constant dense<0.000000e+00> : vector<1xf32>
      %100 = vector.multi_reduction <add>, %99, %cst_66 [1, 2] : vector<1x16x1xf32> to vector<1xf32>
      %101 = vector.shape_cast %100 : vector<1xf32> to vector<1x1x1xf32>
      %102 = vector.extract %101[0, 0, 0] : f32 from vector<1x1x1xf32>
      %103 = vector.broadcast %102 : f32 to vector<1x8x128xf32>
      %c0_67 = arith.constant 0 : index
      %c0_68 = arith.constant 0 : index
      %c0_69 = arith.constant 0 : index
      %104 = vector.load %arg17[%c0_67, %c0_68, %c0_69] : memref<1x8x128xf32, #tpu.memory_space<vmem>>, vector<1x8x128xf32>
      tpu.vector_store %arg17[%c0_67, %c0_68, %c0_69], %103 {strides = array<i32>} : memref<1x8x128xf32, #tpu.memory_space<vmem>>, vector<1x8x128xf32>,
      %105 = arith.truncf %78 : vector<16x128xf32> to vector<16x128xbf16>
      %c0_70 = arith.constant 0 : index
      %c0_71 = arith.constant 0 : index
      %106 = vector.load %arg15[%c0_70, %c0_71] : memref<16x128xbf16, #tpu.memory_space<vmem>>, vector<16x128xbf16>
      tpu.vector_store %arg15[%c0_70, %c0_71], %105 {strides = array<i32>} : memref<16x128xbf16, #tpu.memory_space<vmem>>, vector<16x128xbf16>,
    } else {
    }
    %c0 = arith.constant 0 : index
    %c0_2 = arith.constant 0 : index
    %9 = vector.load %arg18[%c0, %c0_2] : memref<16x256xbf16, #tpu.memory_space<vmem>>, vector<16x256xbf16>
    %c0_3 = arith.constant 0 : index
    %c0_4 = arith.constant 0 : index
    %10 = vector.load %arg8[%c0_3, %c0_4] : memref<256x256xbf16, #tpu.memory_space<vmem>>, vector<256x256xbf16>
    %cst = arith.constant dense<0.000000e+00> : vector<16x256xf32>
    %11 = tpu.matmul %9, %10, %cst {dimension_numbers = #tpu.dot_dimension_numbers<[1], [0], [0], [1], [0, 0, 1, 1], [], []>} : vector<16x256xbf16>, vector<256x256xbf16>, vector<16x256xf32> -> vector<16x256xf32>
    %c0_5 = arith.constant 0 : index
    %c0_6 = arith.constant 0 : index
    %12 = vector.load %arg9[%c0_5, %c0_6] : memref<1x256xf32, #tpu.memory_space<vmem>>, vector<1x256xf32>
    %13 = vector.broadcast %12 : vector<1x256xf32> to vector<16x256xf32>
    %14 = arith.addf %11, %13 : vector<16x256xf32>
    %15 = arith.truncf %14 : vector<16x256xf32> to vector<16x256xbf16>
    %c0_7 = arith.constant 0 : index
    %c0_8 = arith.constant 0 : index
    %16 = vector.load %arg14[%c0_7, %c0_8] : memref<16x256xbf16, #tpu.memory_space<vmem>>, vector<16x256xbf16>
    tpu.vector_store %arg14[%c0_7, %c0_8], %15 {strides = array<i32>} : memref<16x256xbf16, #tpu.memory_space<vmem>>, vector<16x256xbf16>,
    %c0_9 = arith.constant 0 : index
    %c0_10 = arith.constant 0 : index
    %17 = vector.load %arg19[%c0_9, %c0_10] : memref<16x1xf32, #tpu.memory_space<vmem>>, vector<16x1xf32>
    %cst_11 = arith.constant dense<0xFF800000> : vector<16xf32>
    %18 = vector.multi_reduction <maximumf>, %14, %cst_11 [1] : vector<16x256xf32> to vector<16xf32>
    %19 = vector.shape_cast %18 : vector<16xf32> to vector<16x1xf32>
    %20 = arith.maximumf %17, %19 : vector<16x1xf32>
    %c0_12 = arith.constant 0 : index
    %c0_13 = arith.constant 0 : index
    %21 = vector.load %arg20[%c0_12, %c0_13] : memref<16x1xf32, #tpu.memory_space<vmem>>, vector<16x1xf32>
    %22 = arith.subf %17, %20 : vector<16x1xf32>
    %23 = math.exp %22 : vector<16x1xf32>
    %24 = arith.mulf %21, %23 : vector<16x1xf32>
    %25 = vector.broadcast %20 : vector<16x1xf32> to vector<16x256xf32>
    %26 = arith.subf %14, %25 : vector<16x256xf32>
    %27 = math.exp %26 : vector<16x256xf32>
    %cst_14 = arith.constant dense<0.000000e+00> : vector<16xf32>
    %28 = vector.multi_reduction <add>, %27, %cst_14 [1] : vector<16x256xf32> to vector<16xf32>
    %29 = vector.shape_cast %28 : vector<16xf32> to vector<16x1xf32>
    %30 = arith.addf %24, %29 : vector<16x1xf32>
    %c0_15 = arith.constant 0 : index
    %c0_16 = arith.constant 0 : index
    %31 = vector.load %arg20[%c0_15, %c0_16] : memref<16x1xf32, #tpu.memory_space<vmem>>, vector<16x1xf32>
    tpu.vector_store %arg20[%c0_15, %c0_16], %30 {strides = array<i32>} : memref<16x1xf32, #tpu.memory_space<vmem>>, vector<16x1xf32>,
    %c0_17 = arith.constant 0 : index
    %c0_18 = arith.constant 0 : index
    %32 = vector.load %arg19[%c0_17, %c0_18] : memref<16x1xf32, #tpu.memory_space<vmem>>, vector<16x1xf32>
    tpu.vector_store %arg19[%c0_17, %c0_18], %20 {strides = array<i32>} : memref<16x1xf32, #tpu.memory_space<vmem>>, vector<16x1xf32>,
    %33 = tpu.iota {dimensions = array<i32: 1>} : vector<16x256xi32>
    %c256_i32 = arith.constant 256 : i32
    %34 = arith.muli %arg1, %c256_i32 : i32
    %35 = vector.broadcast %34 : i32 to vector<16x256xi32>
    %36 = arith.addi %33, %35 : vector<16x256xi32>
    %c0_19 = arith.constant 0 : index
    %c0_20 = arith.constant 0 : index
    %37 = vector.load %arg21[%c0_19, %c0_20] : memref<16x1xf32, #tpu.memory_space<vmem>>, vector<16x1xf32>
    %c0_21 = arith.constant 0 : index
    %c0_22 = arith.constant 0 : index
    %38 = vector.load %arg4[%c0_21, %c0_22] : memref<16x1xi32, #tpu.memory_space<vmem>>, vector<16x1xi32>
    %39 = vector.broadcast %38 : vector<16x1xi32> to vector<16x256xi32>
    %40 = arith.cmpi eq, %36, %39 : vector<16x256xi32>
    %cst_23 = arith.constant 0.000000e+00 : f32
    %41 = vector.broadcast %cst_23 : f32 to vector<16x256xf32>
    %42 = arith.select %40, %14, %41 : vector<16x256xi1>, vector<16x256xf32>
    %cst_24 = arith.constant dense<0.000000e+00> : vector<16xf32>
    %43 = vector.multi_reduction <add>, %42, %cst_24 [1] : vector<16x256xf32> to vector<16xf32>
    %44 = vector.shape_cast %43 : vector<16xf32> to vector<16x1xf32>
    %45 = arith.addf %37, %44 : vector<16x1xf32>
    %c0_25 = arith.constant 0 : index
    %c0_26 = arith.constant 0 : index
    %46 = vector.load %arg21[%c0_25, %c0_26] : memref<16x1xf32, #tpu.memory_space<vmem>>, vector<16x1xf32>
    tpu.vector_store %arg21[%c0_25, %c0_26], %45 {strides = array<i32>} : memref<16x1xf32, #tpu.memory_space<vmem>>, vector<16x1xf32>,
    %c0_i32_27 = arith.constant 0 : i32
    %47 = arith.cmpi eq, %arg1, %c0_i32_27 : i32
    %48 = arith.extui %47 : i1 to i32
    %c0_i32_28 = arith.constant 0 : i32
    %49 = arith.cmpi ne, %48, %c0_i32_28 : i32
    scf.if %49 {
      %c0_29 = arith.constant 0 : index
      %c0_30 = arith.constant 0 : index
      %50 = vector.load %arg19[%c0_29, %c0_30] : memref<16x1xf32, #tpu.memory_space<vmem>>, vector<16x1xf32>
      %c0_31 = arith.constant 0 : index
      %c0_32 = arith.constant 0 : index
      %51 = vector.load %arg20[%c0_31, %c0_32] : memref<16x1xf32, #tpu.memory_space<vmem>>, vector<16x1xf32>
      %52 = math.log %51 : vector<16x1xf32>
      %53 = arith.addf %50, %52 : vector<16x1xf32>
      %c0_33 = arith.constant 0 : index
      %c0_34 = arith.constant 0 : index
      %54 = vector.load %arg21[%c0_33, %c0_34] : memref<16x1xf32, #tpu.memory_space<vmem>>, vector<16x1xf32>
      %55 = arith.subf %53, %54 : vector<16x1xf32>
      %cst_35 = arith.constant 0.000000e+00 : f32
      %56 = vector.broadcast %cst_35 : f32 to vector<16x1xf32>
      %57 = arith.select %5, %55, %56 : vector<16x1xi1>, vector<16x1xf32>
      %58 = vector.shape_cast %57 : vector<16x1xf32> to vector<1x16x1xf32>
      %cst_36 = arith.constant dense<0.000000e+00> : vector<1xf32>
      %59 = vector.multi_reduction <add>, %58, %cst_36 [1, 2] : vector<1x16x1xf32> to vector<1xf32>
      %60 = vector.shape_cast %59 : vector<1xf32> to vector<1x1x1xf32>
      %61 = vector.extract %60[0, 0, 0] : f32 from vector<1x1x1xf32>
      %62 = vector.broadcast %61 : f32 to vector<1x8x128xf32>
      %c0_37 = arith.constant 0 : index
      %c0_38 = arith.constant 0 : index
      %c0_39 = arith.constant 0 : index
      %63 = vector.load %arg16[%c0_37, %c0_38, %c0_39] : memref<1x8x128xf32, #tpu.memory_space<vmem>>, vector<1x8x128xf32>
      tpu.vector_store %arg16[%c0_37, %c0_38, %c0_39], %62 {strides = array<i32>} : memref<1x8x128xf32, #tpu.memory_space<vmem>>, vector<1x8x128xf32>,
    } else {
    }
    return
  }
  func.func @transform_0(%arg0: i32, %arg1: i32) -> (i32, i32) {
    %c0_i32 = arith.constant 0 : i32
    %c0_i32_0 = arith.constant 0 : i32
    return %arg0, %c0_i32 : i32, i32
  }
  func.func @transform_1(%arg0: i32, %arg1: i32) -> (i32, i32) {
    %c0_i32 = arith.constant 0 : i32
    %c0_i32_0 = arith.constant 0 : i32
    return %arg0, %c0_i32 : i32, i32
  }
  func.func @transform_2(%arg0: i32, %arg1: i32) -> (i32, i32) {
    %c0_i32 = arith.constant 0 : i32
    %c0_i32_0 = arith.constant 0 : i32
    return %arg0, %c0_i32 : i32, i32
  }
  func.func @transform_3(%arg0: i32, %arg1: i32) -> (i32, i32) {
    %c0_i32 = arith.constant 0 : i32
    %c0_i32_0 = arith.constant 0 : i32
    return %arg0, %c0_i32 : i32, i32
  }
  func.func @transform_4(%arg0: i32, %arg1: i32) -> (i32, i32) {
    %c0_i32 = arith.constant 0 : i32
    %c0_i32_0 = arith.constant 0 : i32
    %c0_i32_1 = arith.constant 0 : i32
    return %c0_i32, %c0_i32_0 : i32, i32
  }
  func.func @transform_5(%arg0: i32, %arg1: i32) -> (i32, i32) {
    %c0_i32 = arith.constant 0 : i32
    %c0_i32_0 = arith.constant 0 : i32
    %c0_i32_1 = arith.constant 0 : i32
    return %c0_i32, %c0_i32_0 : i32, i32
  }
  func.func @transform_6(%arg0: i32, %arg1: i32) -> (i32, i32) {
    %c0_i32 = arith.constant 0 : i32
    %c0_i32_0 = arith.constant 0 : i32
    return %c0_i32, %arg1 : i32, i32
  }
  func.func @transform_7(%arg0: i32, %arg1: i32) -> (i32, i32) {
    %c0_i32 = arith.constant 0 : i32
    %c0_i32_0 = arith.constant 0 : i32
    return %c0_i32, %arg1 : i32, i32
  }
  func.func @transform_8(%arg0: i32, %arg1: i32) -> (i32, i32) {
    %c0_i32 = arith.constant 0 : i32
    %c0_i32_0 = arith.constant 0 : i32
    %c0_i32_1 = arith.constant 0 : i32
    return %c0_i32, %c0_i32_0 : i32, i32
  }
  func.func @transform_9(%arg0: i32, %arg1: i32) -> (i32, i32) {
    %c0_i32 = arith.constant 0 : i32
    %c0_i32_0 = arith.constant 0 : i32
    %c0_i32_1 = arith.constant 0 : i32
    return %c0_i32, %c0_i32_0 : i32, i32
  }
  func.func @transform_10(%arg0: i32, %arg1: i32) -> (i32, i32) {
    %c0_i32 = arith.constant 0 : i32
    %c0_i32_0 = arith.constant 0 : i32
    %c0_i32_1 = arith.constant 0 : i32
    return %c0_i32, %c0_i32_0 : i32, i32
  }
  func.func @transform_11(%arg0: i32, %arg1: i32) -> (i32, i32) {
    %c0_i32 = arith.constant 0 : i32
    %c0_i32_0 = arith.constant 0 : i32
    %c0_i32_1 = arith.constant 0 : i32
    return %c0_i32, %c0_i32_0 : i32, i32
  }
  func.func @transform_12(%arg0: i32, %arg1: i32) -> (i32, i32) {
    %c0_i32 = arith.constant 0 : i32
    return %arg0, %arg1 : i32, i32
  }
  func.func @transform_13(%arg0: i32, %arg1: i32) -> (i32, i32) {
    %c0_i32 = arith.constant 0 : i32
    %c0_i32_0 = arith.constant 0 : i32
    return %arg0, %c0_i32 : i32, i32
  }
  func.func @transform_14(%arg0: i32, %arg1: i32) -> (i32, i32, i32) {
    %c0_i32 = arith.constant 0 : i32
    %c0_i32_0 = arith.constant 0 : i32
    %c0_i32_1 = arith.constant 0 : i32
    return %arg0, %c0_i32, %c0_i32_0 : i32, i32, i32
  }
  func.func @transform_15(%arg0: i32, %arg1: i32) -> (i32, i32, i32) {
    %c0_i32 = arith.constant 0 : i32
    %c0_i32_0 = arith.constant 0 : i32
    %c0_i32_1 = arith.constant 0 : i32
    return %arg0, %c0_i32, %c0_i32_0 : i32, i32, i32
  }
}

</mosaic_0001>

<bundles_post_ra>
// kernel: edge_model_forward.1
= control target key start
LH: loop header
LB: loop body
LE: loop exit
PB: predicated region body
PF: predicated region fallthrough
CT: control target
= control target key end

     0   :  { %v1459_v1 = vmov 0   ;;  %vm330_vm0 = vcmask 7168   ;;  %s1961_s4 = inlined_call_operand.vmem [shape: bf16[256,256], index: 4, kind: input, shape index: {}]   ;;  %s1962_s8 = inlined_call_operand.vmem [shape: bf16[128,256], index: 8, kind: input, shape index: {}]   ;;  %s1963_s1 = inlined_call_operand.vmem [shape: bf16[16,128], index: 1, kind: input, shape index: {}]   ;;  %s1964_s0 = inlined_call_operand.vmem [shape: bf16[16,128], index: 0, kind: input, shape index: {}]   ;;  %s1965_s6 = inlined_call_operand.vmem [shape: bf16[256,256], index: 6, kind: input, shape index: {}]   ;;  %s1966_s10 = inlined_call_operand.vmem [shape: bf16[256,128], index: 10, kind: input, shape index: {}]   ;;  %s1967_s9 = inlined_call_operand.vmem [shape: f32[1,256], index: 9, kind: input, shape index: {}]   ;;  %s1968_s5 = inlined_call_operand.vmem [shape: f32[1,256], index: 5, kind: input, shape index: {}]   ;;  %s1969_s7 = inlined_call_operand.vmem [shape: f32[1,256], index: 7, kind: input, shape index: {}]   ;;  %s1970_s12 = inlined_call_operand.vmem [shape: bf16[16,256], index: 12, kind: output, shape index: {0}]   ;;  %s1971_s11 = inlined_call_operand.vmem [shape: f32[1,128], index: 11, kind: input, shape index: {}]   ;;  %s1972_s2 = inlined_call_operand.vmem [shape: s32[16,1], index: 2, kind: input, shape index: {}]   ;;  %s1973_s3 = inlined_call_operand.vmem [shape: s32[16,1], index: 3, kind: input, shape index: {}]   ;;  %s1974_s13 = inlined_call_operand.vmem [shape: bf16[16,128], index: 13, kind: output, shape index: {1}]   ;;  %s1975_s15 = inlined_call_operand.vmem [shape: f32[1,8,128], index: 15, kind: output, shape index: {3}]   ;;  %s1976_s14 = inlined_call_operand.vmem [shape: f32[1,8,128], index: 14, kind: output, shape index: {2}]  }
   0x1   :  { %v1281_v0 = vld [vmem:[%s1961_s4 + $0x4] ss:$8 sps:$4 sm:$0xff]   ;;  %477 = vmatprep.mubr.bf16.mxu1 %v1459_v1  ;;  %1280 = vset.pattern.permute.xlu0 %v1459_v1  ;;  %v1283_v2 = vld [vmem:[%s1961_s4] ss:$8 sps:$4 sm:$0xff]   ;;  %v1284_v3 = vld [vmem:[%s1961_s4 + $0x14] ss:$8 sps:$4 sm:$0xff]  }
   0x2   :  { %1279 = vset.pattern.permute.xlu1 %v1459_v1  ;;  %279 = vmatprep.subr.bf16.mxu0 %v1281_v0  ;;  %v1286_v4 = vld [vmem:[%s1961_s4 + $0x10] ss:$8 sps:$4 sm:$0xff]   ;;  %v1287_v5 = vld [vmem:[%s1961_s4 + $0x24] ss:$8 sps:$4 sm:$0xff]   ;;  %v1289_v6 = vld [vmem:[%s1961_s4 + $0x20] ss:$8 sps:$4 sm:$0xff]  }
   0x3   :  { %280 = vmatpush1.bf16.msra.mxu0 %v1283_v2  ;;  %v1290_v7 = vld [vmem:[%s1961_s4 + $0x34] ss:$8 sps:$4 sm:$0xff]   ;;  %v1292_v8 = vld [vmem:[%s1961_s4 + $0x30] ss:$8 sps:$4 sm:$0xff]   ;;  %v1293_v9 = vld [vmem:[%s1961_s4 + $0x44] ss:$8 sps:$4 sm:$0xff]  }
   0x4   :  { %281 = vmatprep.subr.bf16.mxu0 %v1284_v3  ;;  %v1295_v10 = vld [vmem:[%s1961_s4 + $0x40] ss:$8 sps:$4 sm:$0xff]   ;;  %v1313_v11 = vld [vmem:[%s1962_s8 + $0x4] ss:$8 sps:$4 sm:$0xff]   ;;  %v1296_v13 = vld [vmem:[%s1961_s4 + $0x54] ss:$8 sps:$4 sm:$0xff]  }
   0x5   :  { %v1316_v12 = vld [vmem:[%s1962_s8] ss:$8 sps:$4 sm:$0xff]   ;;  %445 = vmatprep.subr.bf16.mxu1 %v1313_v11  ;;  %v1319_v14 = vld [vmem:[%s1962_s8 + $0x14] ss:$8 sps:$4 sm:$0xff]   ;;  %v1322_v15 = vld [vmem:[%s1962_s8 + $0x10] ss:$8 sps:$4 sm:$0xff]  }
   0x6   :  { %446 = vmatpush1.bf16.msra.mxu1 %v1316_v12  ;;  %v1298_v16 = vld [vmem:[%s1961_s4 + $0x50] ss:$8 sps:$4 sm:$0xff]   ;;  %v1299_v17 = vld [vmem:[%s1961_s4 + $0x64] ss:$8 sps:$4 sm:$0xff]   ;;  %v1328_v19 = vld [vmem:[%s1962_s8 + $0x20] ss:$8 sps:$4 sm:$0xff]  }
   0x7   :  { %282 = vmatpush1.bf16.msra.mxu0 %v1286_v4  ;;  %447 = vmatprep.subr.bf16.mxu1 %v1319_v14  ;;  %v1325_v18 = vld [vmem:[%s1962_s8 + $0x24] ss:$8 sps:$4 sm:$0xff]   ;;  %v1301_v20 = vld [vmem:[%s1961_s4 + $0x60] ss:$8 sps:$4 sm:$0xff]   ;;  %v1331_v21 = vld [vmem:[%s1962_s8 + $0x34] ss:$8 sps:$4 sm:$0xff]  }
   0x8   :  { %283 = vmatprep.subr.bf16.mxu0 %v1287_v5  ;;  %v1302_v22 = vld [vmem:[%s1961_s4 + $0x74] ss:$8 sps:$4 sm:$0xff]   ;;  %v1304_v23 = vld [vmem:[%s1961_s4 + $0x70] ss:$8 sps:$4 sm:$0xff]   ;;  %v1337_v25 = vld [vmem:[%s1962_s8 + $0x44] ss:$8 sps:$4 sm:$0xff]  }
   0x9   :  { %v1334_v24 = vld [vmem:[%s1962_s8 + $0x30] ss:$8 sps:$4 sm:$0xff]   ;;  %v1305_v26 = vld [vmem:[%s1961_s4 + $0x84] ss:$8 sps:$4 sm:$0xff]   ;;  %v1307_v27 = vld [vmem:[%s1961_s4 + $0x80] ss:$8 sps:$4 sm:$0xff]  }
   0xa   :  { %448 = vmatpush1.bf16.msra.mxu1 %v1322_v15  ;;  %v1340_v28 = vld [vmem:[%s1962_s8 + $0x40] ss:$8 sps:$4 sm:$0xff]   ;;  %v1343_v30 = vld [vmem:[%s1962_s8 + $0x54] ss:$8 sps:$4 sm:$0xff]   ;;  %v1310_v32 = vld [vmem:[%s1961_s4 + $0x90] ss:$8 sps:$4 sm:$0xff]  }
   0xb   :  { %284 = vmatpush1.bf16.msra.mxu0 %v1289_v6  ;;  %449 = vmatprep.subr.bf16.mxu1 %v1325_v18  ;;  %v1347_v29 = vld [vmem:[%s1963_s1] sm:$0xff]   ;;  %v1308_v31 = vld [vmem:[%s1961_s4 + $0x94] ss:$8 sps:$4 sm:$0xff]   ;;  %v1346_v33 = vld [vmem:[%s1962_s8 + $0x50] ss:$8 sps:$4 sm:$0xff]  }
   0xc   :  { %285 = vmatprep.subr.bf16.mxu0 %v1290_v7  ;;  %311 = vmatprep.mubr.bf16.mxu0 %v1347_v29  ;;  %v1349_v34 = vld [vmem:[%s1962_s8 + $0x64] ss:$8 sps:$4 sm:$0xff]   ;;  %v1315_v36 = vld [vmem:[%s1961_s4 + $0xa0] ss:$8 sps:$4 sm:$0xff]   ;;  %v1352_v38 = vld [vmem:[%s1962_s8 + $0x74] ss:$8 sps:$4 sm:$0xff]  }
   0xd   :  { %v1311_v35 = vld [vmem:[%s1961_s4 + $0xa4] ss:$8 sps:$4 sm:$0xff]   ;;  %v1351_v37 = vld [vmem:[%s1962_s8 + $0x60] ss:$8 sps:$4 sm:$0xff]   ;;  %v1317_v39 = vld [vmem:[%s1961_s4 + $0xb4] ss:$8 sps:$4 sm:$0xff]  }
   0xe   :  { %450 = vmatpush1.bf16.msra.mxu1 %v1328_v19  ;;  %v1354_v40 = vld [vmem:[%s1962_s8 + $0x70] ss:$8 sps:$4 sm:$0xff]   ;;  %v1323_v42 = vld [vmem:[%s1961_s4 + $0xc4] ss:$8 sps:$4 sm:$0xff]   ;;  %v1327_v43 = vld [vmem:[%s1961_s4 + $0xc0] ss:$8 sps:$4 sm:$0xff]  }
   0xf   :  { %286 = vmatpush1.bf16.msra.mxu0 %v1292_v8  ;;  %451 = vmatprep.subr.bf16.mxu1 %v1331_v21  ;;  %v1321_v41 = vld [vmem:[%s1961_s4 + $0xb0] ss:$8 sps:$4 sm:$0xff]   ;;  %v1329_v44 = vld [vmem:[%s1961_s4 + $0xd4] ss:$8 sps:$4 sm:$0xff]   ;;  %v1348_v45 = vld [vmem:[%s1964_s0] sm:$0xff]  }
  0x10   :  { %287 = vmatprep.subr.bf16.mxu0 %v1293_v9  ;;  %v1385_v46 = vld [vmem:[%s1966_s10 + $0x40] sm:$0xff]   ;;  %v1333_v47 = vld [vmem:[%s1961_s4 + $0xd0] ss:$8 sps:$4 sm:$0xff]   ;;  %v1341_v51 = vld [vmem:[%s1961_s4 + $0xf4] ss:$8 sps:$4 sm:$0xff]  }
  0x11   :  { %v1335_v48 = vld [vmem:[%s1961_s4 + $0xe4] ss:$8 sps:$4 sm:$0xff]   ;;  %v1339_v50 = vld [vmem:[%s1961_s4 + $0xe0] ss:$8 sps:$4 sm:$0xff]   ;;  %v1345_v52 = vld [vmem:[%s1961_s4 + $0xf0] ss:$8 sps:$4 sm:$0xff]  }
  0x12   :  { %452 = vmatpush1.bf16.msra.mxu1 %v1334_v24  ;;  %v1389_v49 = vld [vmem:[%s1966_s10] sm:$0xff]   ;;  %v1360_v55 = vld [vmem:[%s1965_s6 + $0x14] ss:$8 sps:$4 sm:$0xff]   ;;  %v1358_v56 = vld [vmem:[%s1965_s6 + $0x10] ss:$8 sps:$4 sm:$0xff]  }
  0x13   :  { %288 = vmatpush1.bf16.msra.mxu0 %v1295_v10  ;;  %453 = vmatprep.subr.bf16.mxu1 %v1337_v25  ;;  %v1357_v53 = vld [vmem:[%s1965_s6 + $0x4] ss:$8 sps:$4 sm:$0xff]   ;;  %v1355_v54 = vld [vmem:[%s1965_s6] ss:$8 sps:$4 sm:$0xff]   ;;  %v1366_v59 = vld [vmem:[%s1965_s6 + $0x34] ss:$8 sps:$4 sm:$0xff]  }
  0x14   :  { %289 = vmatprep.subr.bf16.mxu0 %v1296_v13  ;;  %v1363_v57 = vld [vmem:[%s1965_s6 + $0x24] ss:$8 sps:$4 sm:$0xff]   ;;  %v1361_v58 = vld [vmem:[%s1965_s6 + $0x20] ss:$8 sps:$4 sm:$0xff]   ;;  %v1364_v60 = vld [vmem:[%s1965_s6 + $0x30] ss:$8 sps:$4 sm:$0xff]  }
  0x15   :  { %v1369_v61 = vld [vmem:[%s1965_s6 + $0x44] ss:$8 sps:$4 sm:$0xff]   ;;  %v1367_v62 = vld [vmem:[%s1965_s6 + $0x40] ss:$8 sps:$4 sm:$0xff]   ;;  %v1372_v63 = vld [vmem:[%s1965_s6 + $0x54] ss:$8 sps:$4 sm:$0xff]  }
  0x16   :  { %454 = vmatpush1.bf16.msra.mxu1 %v1340_v28  ;;  %v1370_v0 = vld [vmem:[%s1965_s6 + $0x50] ss:$8 sps:$4 sm:$0xff]   ;;  %v1375_v1 = vld [vmem:[%s1965_s6 + $0x64] ss:$8 sps:$4 sm:$0xff]   ;;  %v1373_v2 = vld [vmem:[%s1965_s6 + $0x60] ss:$8 sps:$4 sm:$0xff]  }
  0x17   :  { %290 = vmatpush1.bf16.msra.mxu0 %v1298_v16  ;;  %455 = vmatprep.subr.bf16.mxu1 %v1343_v30  ;;  %v1378_v3 = vld [vmem:[%s1965_s6 + $0x74] ss:$8 sps:$4 sm:$0xff]   ;;  %v1376_v4 = vld [vmem:[%s1965_s6 + $0x70] ss:$8 sps:$4 sm:$0xff]   ;;  %v1381_v5 = vld [vmem:[%s1965_s6 + $0x84] ss:$8 sps:$4 sm:$0xff]  }
  0x18   :  { %291 = vmatprep.subr.bf16.mxu0 %v1299_v17  ;;  %v1379_v6 = vld [vmem:[%s1965_s6 + $0x80] ss:$8 sps:$4 sm:$0xff]   ;;  %v1384_v7 = vld [vmem:[%s1965_s6 + $0x94] ss:$8 sps:$4 sm:$0xff]   ;;  %v1382_v8 = vld [vmem:[%s1965_s6 + $0x90] ss:$8 sps:$4 sm:$0xff]  }
  0x19   :  { %v1388_v9 = vld [vmem:[%s1965_s6 + $0xa4] ss:$8 sps:$4 sm:$0xff]   ;;  %v1386_v10 = vld [vmem:[%s1965_s6 + $0xa0] ss:$8 sps:$4 sm:$0xff]   ;;  %v1393_v12 = vld [vmem:[%s1965_s6 + $0xb4] ss:$8 sps:$4 sm:$0xff]  }
  0x1a   :  { %456 = vmatpush1.bf16.msra.mxu1 %v1346_v33  ;;  %v1390_v11 = vld [vmem:[%s1966_s10 + $0x48] sm:$0xff]   ;;  %v1391_v13 = vld [vmem:[%s1965_s6 + $0xb0] ss:$8 sps:$4 sm:$0xff]   ;;  %v1403_v21 = vld [vmem:[%s1965_s6 + $0xd4] ss:$8 sps:$4 sm:$0xff]  }
  0x1b   :  { %292 = vmatpush1.bf16.msra.mxu0 %v1301_v20  ;;  %457 = vmatprep.subr.bf16.mxu1 %v1349_v34  ;;  %v1394_v14 = vld [vmem:[%s1966_s10 + $0x8] sm:$0xff]   ;;  %v1395_v15 = vld [vmem:[%s1966_s10 + $0x50] sm:$0xff]   ;;  %v1400_v19 = vld [vmem:[%s1966_s10 + $0x58] sm:$0xff]  }
  0x1c   :  { %293 = vmatprep.subr.bf16.mxu0 %v1302_v22  ;;  %v1398_v16 = vld [vmem:[%s1965_s6 + $0xc4] ss:$8 sps:$4 sm:$0xff]   ;;  %v1396_v17 = vld [vmem:[%s1965_s6 + $0xc0] ss:$8 sps:$4 sm:$0xff]   ;;  %v1399_v18 = vld [vmem:[%s1966_s10 + $0x10] sm:$0xff]  }
  0x1d   :  { %v1401_v20 = vld [vmem:[%s1965_s6 + $0xd0] ss:$8 sps:$4 sm:$0xff]   ;;  %v1408_v24 = vld [vmem:[%s1965_s6 + $0xe4] ss:$8 sps:$4 sm:$0xff]   ;;  %v1406_v25 = vld [vmem:[%s1965_s6 + $0xe0] ss:$8 sps:$4 sm:$0xff]  }
  0x1e   :  { %458 = vmatpush1.bf16.msra.mxu1 %v1351_v37  ;;  %v1404_v22 = vld [vmem:[%s1966_s10 + $0x18] sm:$0xff]   ;;  %v1414_v30 = vld [vmem:[%s1966_s10 + $0x28] sm:$0xff]   ;;  %v353_v37 = vld [vmem:[%s1967_s9] sm:$0x3] }
  0x1f   :  { %294 = vmatpush1.bf16.msra.mxu0 %v1304_v23  ;;  %459 = vmatprep.subr.bf16.mxu1 %v1352_v38  ;;  %v1405_v23 = vld [vmem:[%s1966_s10 + $0x60] sm:$0xff]   ;;  %v1413_v28 = vld [vmem:[%s1965_s6 + $0xf4] ss:$8 sps:$4 sm:$0xff]   ;;  %v1411_v29 = vld [vmem:[%s1965_s6 + $0xf0] ss:$8 sps:$4 sm:$0xff]  }
  0x20   :  { %295 = vmatprep.subr.bf16.mxu0 %v1305_v26  ;;  %v1409_v26 = vld [vmem:[%s1966_s10 + $0x20] sm:$0xff]   ;;  %v1417_v33 = vld [vmem:[%s1966_s10 + $0x78] sm:$0xff]  }
  0x21   :  { %v1418_v34 = vld [vmem:[%s1966_s10 + $0x38] sm:$0xff]  }
  0x22   :  { %460 = vmatpush1.bf16.msra.mxu1 %v1354_v40 }
  0x23   :  { %296 = vmatpush1.bf16.msra.mxu0 %v1307_v27  ;;  %1250 = vmatprep.subr.bf16.mxu1 %v1385_v46  ;;  %v1410_v27 = vld [vmem:[%s1966_s10 + $0x68] sm:$0xff]  }
  0x24   :  { %297 = vmatprep.subr.bf16.mxu0 %v1308_v31  ;;  %v1415_v31 = vld [vmem:[%s1966_s10 + $0x70] sm:$0xff]  }
  0x25   :  { %478 = vmatmul.mubr.bf16.vlgmr.msra.gmra.mrb[0].mxu1 %v1348_v45 }
  0x26   :  { %1251 = vmatpush3.bf16.msra.mxu1 %v1389_v49 }
  0x27   :  { %298 = vmatpush1.bf16.msra.mxu0 %v1310_v32  ;;  %1252 = vmatprep.subr.bf16.mxu1 %v1390_v11  ;;  %v1416_v32 = vld [vmem:[%s1966_s10 + $0x30] sm:$0xff]  }
  0x28   :  { %299 = vmatprep.subr.bf16.mxu0 %v1311_v35  ;;  %v109_v35 = vlaneseq }
  0x2a   :  { %1253 = vmatpush3.bf16.msra.mxu1 %v1394_v14 }
  0x2b   :  { %300 = vmatpush1.bf16.msra.mxu0 %v1315_v36  ;;  %1254 = vmatprep.subr.bf16.mxu1 %v1395_v15  ;;  %v110_v36 = vshrl.u32 %v109_v35, 7 }
  0x2c   :  { %301 = vmatprep.subr.bf16.mxu0 %v1317_v39 }
  0x2d   :  { %v111_v38 = vsub.s32 0, %v110_v36  ;;  %v115_v39 = vsub.s32 1, %v110_v36  ;;  %v693_v36 = vld [vmem:[%s1973_s3 + $0x8] sm:$0xff] }
  0x2e   :  { %1255 = vmatpush3.bf16.msra.mxu1 %v1399_v18 }
  0x2f   :  { %302 = vmatpush1.bf16.msra.mxu0 %v1321_v41  ;;  %1256 = vmatprep.subr.bf16.mxu1 %v1400_v19  ;;  %v358_v40 = vrot.slane %v353_v37, %v111_v38  ;;  %v362_v41 = vrot.slane %v353_v37, %v115_v39 }
  0x30   :  { %303 = vmatprep.subr.bf16.mxu0 %v1323_v42 }
  0x32   :  { %1257 = vmatpush3.bf16.msra.mxu1 %v1404_v22 }
  0x33   :  { %304 = vmatpush1.bf16.msra.mxu0 %v1327_v43  ;;  %1258 = vmatprep.subr.bf16.mxu1 %v1405_v23 }
  0x34   :  { %305 = vmatprep.subr.bf16.mxu0 %v1329_v44 }
  0x36   :  { %1259 = vmatpush3.bf16.msra.mxu1 %v1409_v26 }
  0x37   :  { %306 = vmatpush1.bf16.msra.mxu0 %v1333_v47  ;;  %1260 = vmatprep.subr.bf16.mxu1 %v1410_v27  ;;  %v1188_v27 = vld [vmem:[%s1971_s11] ss:$0 sm:$0xff] }
  0x38   :  { %307 = vmatprep.subr.bf16.mxu0 %v1335_v48 }
  0x3a   :  { %1261 = vmatpush3.bf16.msra.mxu1 %v1414_v30  ;;  %v1461_v30 = vmov 0.0  }
  0x3b   :  { %308 = vmatpush1.bf16.msra.mxu0 %v1339_v50  ;;  %1262 = vmatprep.subr.bf16.mxu1 %v1415_v31  ;;  %v107_v50 = vld [vmem:[%s1968_s5] sm:$0x3]  ;;  %333 = vst.msk [vmem:[#allocation4] sm:$0xff] %vm330_vm0, %v1461_v30  ;;  %334 = vst.msk [vmem:[#allocation4 + $0x8] sm:$0xff] %vm330_vm0, %v1461_v30 }
  0x3c   :  { %309 = vmatprep.subr.bf16.mxu0 %v1341_v51  ;;  %335 = vst.msk [vmem:[#allocation5] sm:$0xff] %vm330_vm0, %v1461_v30  ;;  %336 = vst.msk [vmem:[#allocation5 + $0x8] sm:$0xff] %vm330_vm0, %v1461_v30  ;;  %v1063_v31 = vld [vmem:[%s1972_s2] sm:$0xff] }
  0x3e   :  { %1263 = vmatpush3.bf16.msra.mxu1 %v1416_v32 }
  0x3f   :  { %310 = vmatpush1.bf16.msra.mxu0 %v1345_v52  ;;  %1264 = vmatprep.subr.bf16.mxu1 %v1417_v33  ;;  %v692_v33 = vld [vmem:[%s1973_s3] sm:$0xff] }
  0x40   :  { %942 = vmatprep.subr.bf16.mxu0 %v1357_v53  ;;  %v112_v53 = vrot.slane %v107_v50, %v111_v38 }
  0x42   :  { %312 = vmatmul.mubr.bf16.vlgmr.msra.gmra.mrb[0].mxu0 %v1348_v45  ;;  %1265 = vmatpush3.bf16.msra.mxu1 %v1418_v34 }
  0x43   :  { %943 = vmatpush1.bf16.msra.mxu0 %v1355_v54 }
  0x44   :  { %944 = vmatprep.subr.bf16.mxu0 %v1360_v55  ;;  %v116_v55 = vrot.slane %v107_v50, %v115_v39 }
  0x47   :  { %945 = vmatpush1.bf16.msra.mxu0 %v1358_v56 }
  0x48   :  { %946 = vmatprep.subr.bf16.mxu0 %v1363_v57 }
  0x4b   :  { %947 = vmatpush1.bf16.msra.mxu0 %v1361_v58 }
  0x4c   :  { %948 = vmatprep.subr.bf16.mxu0 %v1366_v59 }
  0x4f   :  { %949 = vmatpush1.bf16.msra.mxu0 %v1364_v60 }
  0x50   :  { %950 = vmatprep.subr.bf16.mxu0 %v1369_v61 }
  0x53   :  { %951 = vmatpush1.bf16.msra.mxu0 %v1367_v62 }
  0x54   :  { %952 = vmatprep.subr.bf16.mxu0 %v1372_v63 }
  0x57   :  { %953 = vmatpush1.bf16.msra.mxu0 %v1370_v0 }
  0x58   :  { %954 = vmatprep.subr.bf16.mxu0 %v1375_v1 }
  0x5b   :  { %955 = vmatpush1.bf16.msra.mxu0 %v1373_v2 }
  0x5c   :  { %956 = vmatprep.subr.bf16.mxu0 %v1378_v3 }
  0x5f   :  { %957 = vmatpush1.bf16.msra.mxu0 %v1376_v4 }
  0x60   :  { %958 = vmatprep.subr.bf16.mxu0 %v1381_v5 }
  0x63   :  { %959 = vmatpush1.bf16.msra.mxu0 %v1379_v6 }
  0x64   :  { %960 = vmatprep.subr.bf16.mxu0 %v1384_v7 }
  0x67   :  { %961 = vmatpush1.bf16.msra.mxu0 %v1382_v8 }
  0x68   :  { %962 = vmatprep.subr.bf16.mxu0 %v1388_v9  ;;  %v1460_v9 = vmov -inf  }
  0x69   :  { %331 = vst.msk [vmem:[#allocation3] sm:$0xff] %vm330_vm0, %v1460_v9  ;;  %332 = vst.msk [vmem:[#allocation3 + $0x8] sm:$0xff] %vm330_vm0, %v1460_v9 }
  0x6b   :  { %963 = vmatpush1.bf16.msra.mxu0 %v1386_v10 }
  0x6c   :  { %964 = vmatprep.subr.bf16.mxu0 %v1393_v12 }
  0x6f   :  { %965 = vmatpush1.bf16.msra.mxu0 %v1391_v13  ;;  %v770_v13 = vld [vmem:[%s1969_s7] sm:$0x3] }
  0x70   :  { %966 = vmatprep.subr.bf16.mxu0 %v1398_v16  ;;  %v775_v14 = vrot.slane %v770_v13, %v111_v38  ;;  %v779_v15 = vrot.slane %v770_v13, %v115_v39 }
  0x73   :  { %967 = vmatpush1.bf16.msra.mxu0 %v1396_v17 }
  0x74   :  { %968 = vmatprep.subr.bf16.mxu0 %v1403_v21 }
  0x77   :  { %969 = vmatpush1.bf16.msra.mxu0 %v1401_v20 }
  0x78   :  { %970 = vmatprep.subr.bf16.mxu0 %v1408_v24 }
  0x7b   :  { %971 = vmatpush1.bf16.msra.mxu0 %v1406_v25 }
  0x7c   :  { %972 = vmatprep.subr.bf16.mxu0 %v1413_v28 }
  0x7f   :  { %973 = vmatpush1.bf16.msra.mxu0 %v1411_v29 }
  0xf8   :  { %v479_v42 = vpop.f32.mrb[0].mxu1 }
  0xf9   :  { %v480_v43 = vadd.f32 %v479_v42, %v358_v40  ;;  %v481_v44 = vpop.f32.mrb[1].mxu1 }
  0xfa   :  { %v482_v45 = vadd.f32 %v481_v44, %v362_v41  ;;  %v483_v46 = vpop.f32.mrb[2].mxu1 }
  0xfb   :  { %1419 = vtanh.f32 %v480_v43  ;;  %v484_v47 = vadd.f32 %v483_v46, %v358_v40  ;;  %v485_v48 = vpop.f32.mrb[3].mxu1  ;;  %v1896_v40 = vld [vmem:[#allocation3] sm:$0xff]  ;;  %v1901_v43 = vld [vmem:[#allocation3 + $0x8] sm:$0xff] }
  0xfc   :  { %1421 = vtanh.f32 %v482_v45  ;;  %v486_v49 = vadd.f32 %v485_v48, %v362_v41  ;;  %v1064_v48 = vld [vmem:[%s1972_s2 + $0x8] sm:$0xff] }
  0xfd   :  { %1423 = vtanh.f32 %v484_v47 }
  0xfe   :  { %1425 = vtanh.f32 %v486_v49 }
 0x105   :  { %v1420_v51 = vpop.eup %1419 }
 0x106   :  { %v1422_v52 = vpop.eup %1421 }
 0x107   :  { %v1424_v54 = vpop.eup %1423 }
 0x108   :  { %v1426_v56 = vpop.eup %1425  ;;  %v492_v57 = vpack.c.bf16 %v1424_v54, %v1420_v51 }
 0x109   :  { %v493_v59 = vpack.c.bf16 %v1426_v56, %v1422_v52 }
 0x10b   :  { %661 = vmatprep.mubr.bf16.mxu1 %v493_v59 }
 0x10c   :  { %662 = vmatmul.mubr.bf16.vlgmr.msra.gmra.mrb[4].mxu1 %v492_v57 }
 0x115   :  { %v313_v58 = vpop.f32.mrb[0].mxu0 }
 0x116   :  { %v314_v60 = vadd.f32 %v313_v58, %v112_v53  ;;  %v315_v61 = vpop.f32.mrb[1].mxu0 }
 0x117   :  { %v316_v62 = vadd.f32 %v315_v61, %v116_v55  ;;  %v317_v63 = vpop.f32.mrb[2].mxu0 }
 0x118   :  { %1427 = vtanh.f32 %v314_v60  ;;  %v318_v0 = vadd.f32 %v317_v63, %v112_v53  ;;  %v319_v1 = vpop.f32.mrb[3].mxu0  ;;  %v691_v63 = vand.u32 127, %v109_v35 }
 0x119   :  { %1429 = vtanh.f32 %v316_v62  ;;  %v320_v2 = vadd.f32 %v319_v1, %v116_v55 }
 0x11a   :  { %1431 = vtanh.f32 %v318_v0 }
 0x11b   :  { %1433 = vtanh.f32 %v320_v2 }
 0x122   :  { %v1428_v3 = vpop.eup %1427 }
 0x123   :  { %v1430_v4 = vpop.eup %1429 }
 0x124   :  { %v1432_v5 = vpop.eup %1431 }
 0x125   :  { %v1434_v6 = vpop.eup %1433  ;;  %v326_v7 = vpack.c.bf16 %v1432_v5, %v1428_v3  ;;  %v1056_v3 = vadd.s32 128, %v691_v63 }
 0x126   :  { %v327_v8 = vpack.c.bf16 %v1434_v6, %v1430_v4 }
 0x128   :  { %974 = vmatprep.mubr.bf16.mxu0 %v327_v8 }
 0x129   :  { %975 = vmatmul.mubr.bf16.vlgmr.msra.gmra.mrb[4].mxu0 %v326_v7 }
 0x1df   :  { %v1266_v10 = vpop.f32.mrb[4].mxu1 }
 0x1e0   :  { %v1267_v11 = vpop.f32.mrb[5].mxu1 }
 0x1e1   :  { %v1268_v12 = vadd.f32 %v1267_v11, %v1266_v10  ;;  %v1269_v32 = vpop.f32.mrb[6].mxu1 }
 0x1e2   :  { %v1270_v34 = vpop.f32.mrb[7].mxu1 }
 0x1e3   :  { %v1873_v29 = vadd.f32 %v1268_v12, %v1188_v27  ;;  %v1271_v37 = vadd.f32 %v1270_v34, %v1269_v32 }
 0x1e5   :  { %v1889_v38 = vadd.f32 %v1271_v37, %v1188_v27 }
 0x1e7   :  { %v1248_v39 = vpack.c.bf16 %v1889_v38, %v1873_v29 }
 0x1e9   :  { %1249 = vst [vmem:[%s1974_s13] sm:$0xff] %v1248_v39  }
 0x1fc   :  { %v976_v16 = vpop.f32.mrb[4].mxu0 }
 0x1fd   :  { %v1848_v17 = vadd.f32 %v976_v16, %v775_v14  ;;  %v978_v18 = vpop.f32.mrb[5].mxu0 }
 0x1fe   :  { %v1850_v19 = vadd.f32 %v978_v18, %v779_v15  ;;  %v980_v20 = vpop.f32.mrb[6].mxu0 }
 0x1ff   :  { %v1852_v21 = vadd.f32 %v980_v20, %v775_v14  ;;  %v982_v22 = vpop.f32.mrb[7].mxu0 }
 0x200   :  { %v1243_v23 = vpack.c.bf16 %v1850_v19, %v1848_v17  ;;  %v1856_v24 = vadd.f32 %v982_v22, %v779_v15  ;;  %v1001_v25 = vmax.f32 %v1848_v17, %v1850_v19 }
 0x202   :  { %997 = vst [vmem:[%s1970_s12] sm:$0xff] %v1243_v23  ;;  %v1244_v26 = vpack.c.bf16 %v1856_v24, %v1852_v21  ;;  %1002 = vmax.xlane.f32.xlu0 %v1001_v25  ;;  %v1004_v28 = vmax.f32 %v1852_v21, %v1856_v24 }
 0x204   :  { %998 = vst [vmem:[%s1970_s12 + $0x8] sm:$0xff] %v1244_v26 }
 0x206   :  { %1005 = vmax.xlane.f32.xlu0 %v1004_v28 }
 0x20a   :  { %670 = vmax.xlane.f32.xlu0 %v1873_v29 }
 0x220   :  { %1066 = vperm.xlu0 %1280, %v1063_v31  }
 0x224   :  { %695 = vperm.xlu0 %1280, %v692_v33  }
 0x228   :  { %698 = vperm.xlu0 %1280, %v693_v36   ;;  %v1061_v36 = vld [vmem:[#allocation5] sm:$0xff] }
 0x28f   :  { %v1003_v41 = vpop.xlane.xlu0 %1002 }
 0x290   :  { %v1899_v42 = vmax.f32 %v1896_v40, %v1003_v41 }
 0x292   :  { %v1011_v44 = vsub.f32 %v1896_v40, %v1899_v42  ;;  %1052 = vst.msk [vmem:[#allocation3] sm:$0xff] %vm330_vm0, %v1899_v42  ;;  %1021 = vperm.xlu1 %1279, %v1899_v42  }
 0x293   :  { %v1006_v45 = vpop.xlane.xlu0 %1005 }
 0x294   :  { %v1909_v46 = vmax.f32 %v1901_v43, %v1006_v45  ;;  %v1013_v23 = vmul.f32 1.442695, %v1011_v44 }
 0x296   :  { %v1012_v47 = vsub.f32 %v1901_v43, %v1909_v46  ;;  %1053 = vst.msk [vmem:[#allocation3 + $0x8] sm:$0xff] %vm330_vm0, %v1909_v46  ;;  %1026 = vperm.xlu1 %1279, %v1909_v46   ;;  %v1062_v43 = vld [vmem:[#allocation5 + $0x8] sm:$0xff] }
 0x297   :  { %v1924_v57 = vpop.xlane.xlu0 %670 }
 0x298   :  { %v674_v60 = vsub.f32 %v1873_v29, %v1924_v57  ;;  %v1015_v25 = vmul.f32 1.442695, %v1012_v47 }
 0x29a   :  { %v676_v61 = vmul.f32 1.442695, %v674_v60 }
 0x29f   :  { %v1067_v5 = vpop.permute.xlu0 %1066 }
 0x2a0   :  { %vm1071_vm1 = vcmp.eq.s32.totalorder %v691_v63, %v1067_v5  ;;  %vm1072_vm2 = vcmp.eq.s32.totalorder %v1056_v3, %v1067_v5 }
 0x2a1   :  { %v1075_v8 = vsel %vm1071_vm1, %v1848_v17, 0.0  ;;  %v1076_v9 = vsel %vm1072_vm2, %v1850_v19, 0.0 }
 0x2a2   :  { %v1079_v10 = vadd.f32 %v1076_v9, %v1075_v8 }
 0x2a3   :  { %v696_v35 = vpop.permute.xlu0 %695 }
 0x2a4   :  { %vm700_vm3 = vcmp.eq.s32.totalorder %v691_v63, %v696_v35 }
 0x2a5   :  { %v702_v11 = vsel %vm700_vm3, %v1873_v29, 0.0  ;;  %v1010_v29 = vld [vmem:[#allocation4 + $0x8] sm:$0xff] }
 0x2ba   :  { %672 = vmax.xlane.f32.xlu1 %v1889_v38 }
 0x2cb   :  { %1069 = vperm.xlu1 %1279, %v1064_v48  }
 0x311   :  { %v1022_v49 = vpop.permute.xlu1 %1021 }
 0x312   :  { %v1029_v50 = vsub.f32 %v1848_v17, %v1022_v49  ;;  %v1030_v51 = vsub.f32 %v1850_v19, %v1022_v49  ;;  %v699_v19 = vpop.permute.xlu0 %698 }
 0x313   :  { %vm701_vm6 = vcmp.eq.s32.totalorder %v691_v63, %v699_v19 }
 0x314   :  { %v1033_v52 = vmul.f32 1.442695, %v1029_v50  ;;  %v1035_v53 = vmul.f32 1.442695, %v1030_v51  ;;  %v703_v22 = vsel %vm701_vm6, %v1889_v38, 0.0  ;;  %v1092_v50 = vld [vmem:[#allocation3] sm:$0xff] }
 0x315   :  { %v1027_v54 = vpop.permute.xlu1 %1026 }
 0x316   :  { %1435 = vpow2.f32 %v1033_v52  ;;  %v1031_v55 = vsub.f32 %v1852_v21, %v1027_v54  ;;  %v1032_v56 = vsub.f32 %v1856_v24, %v1027_v54 }
 0x317   :  { %1437 = vpow2.f32 %v1035_v53 }
 0x318   :  { %v1037_v58 = vmul.f32 1.442695, %v1031_v55  ;;  %v1039_v59 = vmul.f32 1.442695, %v1032_v56  ;;  %v1093_v56 = vld [vmem:[#allocation3 + $0x8] sm:$0xff] }
 0x31a   :  { %1439 = vpow2.f32 %v1037_v58 }
 0x31b   :  { %1441 = vpow2.f32 %v1039_v59 }
 0x31c   :  { %1443 = vpow2.f32 %v676_v61 }
 0x320   :  { %v1436_v62 = vpop.eup %1435 }
 0x321   :  { %v1438_v0 = vpop.eup %1437 }
 0x322   :  { %v1041_v1 = vadd.f32 %v1438_v0, %v1436_v62 }
 0x324   :  { %v1440_v2 = vpop.eup %1439  ;;  %1042 = vadd.xlane.f32.xlu1 %v1041_v1 }
 0x325   :  { %v1442_v4 = vpop.eup %1441 }
 0x326   :  { %v1044_v6 = vadd.f32 %v1442_v4, %v1440_v2  ;;  %v1444_v7 = vpop.eup %1443 }
 0x328   :  { %1045 = vadd.xlane.f32.xlu0 %v1044_v6 }
 0x32c   :  { %680 = vadd.xlane.f32.xlu0 %v1444_v7 }
 0x330   :  { %1080 = vadd.xlane.f32.xlu0 %v1079_v10 }
 0x334   :  { %704 = vadd.xlane.f32.xlu0 %v702_v11 }
 0x347   :  { %v1932_v12 = vpop.xlane.xlu1 %672 }
 0x348   :  { %v675_v13 = vsub.f32 %v1889_v38, %v1932_v12 }
 0x34a   :  { %v678_v14 = vmul.f32 1.442695, %v675_v13 }
 0x34b   :  { %v1070_v15 = vpop.permute.xlu1 %1069 }
 0x34c   :  { %1445 = vpow2.f32 %v678_v14  ;;  %vm1073_vm4 = vcmp.eq.s32.totalorder %v691_v63, %v1070_v15  ;;  %vm1074_vm5 = vcmp.eq.s32.totalorder %v1056_v3, %v1070_v15 }
 0x34d   :  { %v1077_v17 = vsel %vm1073_vm4, %v1852_v21, 0.0  ;;  %v1078_v18 = vsel %vm1074_vm5, %v1856_v24, 0.0  ;;  %1447 = vpow2.f32 %v1013_v23  ;;  %v1009_v24 = vld [vmem:[#allocation4] sm:$0xff] }
 0x34e   :  { %v1082_v20 = vadd.f32 %v1078_v18, %v1077_v17  ;;  %1449 = vpow2.f32 %v1015_v25 }
 0x356   :  { %v1446_v16 = vpop.eup %1445 }
 0x357   :  { %682 = vadd.xlane.f32.xlu1 %v1446_v16  ;;  %v1448_v21 = vpop.eup %1447 }
 0x358   :  { %v1017_v26 = vmul.f32 %v1448_v21, %v1009_v24  ;;  %v1450_v27 = vpop.eup %1449 }
 0x359   :  { %v1018_v31 = vmul.f32 %v1450_v27, %v1010_v29 }
 0x35b   :  { %1083 = vadd.xlane.f32.xlu1 %v1082_v20 }
 0x35f   :  { %706 = vadd.xlane.f32.xlu1 %v703_v22 }
 0x3b1   :  { %v1043_v28 = vpop.xlane.xlu1 %1042 }
 0x3b2   :  { %v1047_v30 = vadd.f32 %v1043_v28, %v1017_v26 }
 0x3b4   :  { %1050 = vst.msk [vmem:[#allocation4] sm:$0xff] %vm330_vm0, %v1047_v30 }
 0x3b5   :  { %v1046_v32 = vpop.xlane.xlu0 %1045 }
 0x3b6   :  { %v1048_v33 = vadd.f32 %v1046_v32, %v1018_v31 }
 0x3b8   :  { %1051 = vst.msk [vmem:[#allocation4 + $0x8] sm:$0xff] %vm330_vm0, %v1048_v33 }
 0x3b9   :  { %v681_v34 = vpop.xlane.xlu0 %680 }
 0x3bb   :  { %v1094_v39 = vld [vmem:[#allocation4] sm:$0xff] }
 0x3bc   :  { %1451 = vlog2.f32 %v1094_v39 }
 0x3bd   :  { %v1081_v37 = vpop.xlane.xlu0 %1080  ;;  %1453 = vlog2.f32 %v681_v34 }
 0x3be   :  { %v1085_v38 = vadd.f32 %v1081_v37, %v1061_v36 }
 0x3bf   :  { %v1095_v40 = vld [vmem:[#allocation4 + $0x8] sm:$0xff] }
 0x3c0   :  { %1087 = vst.msk [vmem:[#allocation5] sm:$0xff] %vm330_vm0, %v1085_v38  ;;  %1455 = vlog2.f32 %v1095_v40 }
 0x3c1   :  { %v705_v59 = vpop.xlane.xlu0 %704 }
 0x3c6   :  { %v1452_v42 = vpop.eup %1451 }
 0x3c7   :  { %v1454_v44 = vpop.eup %1453  ;;  %v1097_v47 = vmul.f32 0.6931472, %v1452_v42  ;;  %v1102_v58 = vld [vmem:[#allocation5] sm:$0xff] }
 0x3c8   :  { %v685_v49 = vmul.f32 0.6931472, %v1454_v44 }
 0x3c9   :  { %v1100_v52 = vadd.f32 %v1097_v47, %v1092_v50 }
 0x3ca   :  { %v1456_v48 = vpop.eup %1455  ;;  %v688_v53 = vadd.f32 %v685_v49, %v1924_v57 }
 0x3cb   :  { %v1099_v51 = vmul.f32 0.6931472, %v1456_v48  ;;  %v1104_v61 = vsub.f32 %v1100_v52, %v1102_v58 }
 0x3cc   :  { %v708_v62 = vsub.f32 %v688_v53, %v705_v59 }
 0x3cd   :  { %v1101_v60 = vadd.f32 %v1099_v51, %v1093_v56  ;;  %v1108_v4 = vsel %vm330_vm0, %v1104_v61, 0.0 }
 0x3ce   :  { %v712_v57 = vsel %vm330_vm0, %v708_v62, 0.0 }
 0x3e4   :  { %v683_v41 = vpop.xlane.xlu1 %682 }
 0x3e5   :  { %1457 = vlog2.f32 %v683_v41 }
 0x3e8   :  { %v1084_v45 = vpop.xlane.xlu1 %1083 }
 0x3e9   :  { %v1086_v46 = vadd.f32 %v1084_v45, %v1062_v43 }
 0x3eb   :  { %1088 = vst.msk [vmem:[#allocation5 + $0x8] sm:$0xff] %vm330_vm0, %v1086_v46 }
 0x3ec   :  { %v707_v1 = vpop.xlane.xlu1 %706 }
 0x3ef   :  { %v1458_v54 = vpop.eup %1457 }
 0x3f0   :  { %v687_v55 = vmul.f32 0.6931472, %v1458_v54 }
 0x3f2   :  { %v689_v63 = vadd.f32 %v687_v55, %v1932_v12  ;;  %v1103_v0 = vld [vmem:[#allocation5 + $0x8] sm:$0xff] }
 0x3f3   :  { %v1105_v2 = vsub.f32 %v1101_v60, %v1103_v0 }
 0x3f4   :  { %v709_v3 = vsub.f32 %v689_v63, %v707_v1 }
 0x3f5   :  { %v1109_v5 = vsel %vm330_vm0, %v1105_v2, 0.0 }
 0x3f6   :  { %v1110_v6 = vadd.f32 %v1109_v5, %v1108_v4  ;;  %v713_v7 = vsel %vm330_vm0, %v709_v3, 0.0 }
 0x3f7   :  { %v714_v8 = vadd.f32 %v713_v7, %v712_v57 }
 0x3f8   :  { %1111 = vadd.xlane.f32.xlu1 %v1110_v6 }
 0x3f9   :  { %715 = vadd.xlane.f32.xlu0 %v714_v8 }
 0x485   :  { %v1112_v9 = vpop.xlane.xlu1 %1111 }
 0x486   :  { %v1113_v10 = vrot.slane %v1112_v9, 4  ;;  %v716_v35 = vpop.xlane.xlu0 %715 }
 0x487   :  { %v717_v11 = vrot.slane %v716_v35, 4 }
 0x488   :  { %v1114_v12 = vadd.f32 %v1113_v10, %v1112_v9 }
 0x489   :  { %v718_v13 = vadd.f32 %v717_v11, %v716_v35 }
 0x48a   :  { %v1115_v14 = vrot.slane %v1114_v12, 2 }
 0x48b   :  { %v719_v15 = vrot.slane %v718_v13, 2 }
 0x48c   :  { %v1116_v16 = vadd.f32 %v1115_v14, %v1114_v12 }
 0x48d   :  { %v720_v17 = vadd.f32 %v719_v15, %v718_v13 }
 0x48e   :  { %v1117_v18 = vrot.slane %v1116_v16, 1 }
 0x48f   :  { %v721_v19 = vrot.slane %v720_v17, 1 }
 0x490   :  { %v1118_v20 = vadd.f32 %v1117_v18, %v1116_v16 }
 0x491   :  { %v722_v22 = vadd.f32 %v721_v19, %v720_v17 }
 0x493   :  { %1272 = vpush %v722_v22 }
 0x494   :  { %1274 = vpush %v1118_v20 }
 0x4c4   :  { %s1273_s2 = spop %1272 }
 0x4c5   :  { %v724_v23 = vstv %s1273_s2  ;;  %s1275_s20 = spop %1274 }
 0x4c6   :  { %725 = vst [vmem:[%s1975_s15] sm:$0xff] %v724_v23  ;;  %v1120_v25 = vstv %s1275_s20 }
 0x4c7   :  { %1121 = vst [vmem:[%s1976_s14] sm:$0xff] %v1120_v25 }

</bundles_post_ra>
